<compile_context>
chip_gen: v7x
topology: tpu7x:2x2x1
jax: 0.10.0
libtpu: 0.0.40
codegen_flags: <defaults>
</compile_context>

<pallas_src>
import functools
import math

import jax
import jax.numpy as jnp
from jax import lax
from jax.experimental import pallas as pl
from jax.experimental.pallas import tpu as pltpu


# --------------------------------------------------------------------------- #
# Kernel 1: fused QKV projection (batch-flattened rows)
# --------------------------------------------------------------------------- #
def _qkv_proj_kernel(x_ref, wqkv_ref, bqkv_ref, q_ref, k_ref, v_ref):
    E = x_ref.shape[-1]
    x = x_ref[...].astype(jnp.bfloat16)                               # (ts, E)
    qkv = jnp.dot(x, wqkv_ref[...], preferred_element_type=jnp.float32)
    qkv = qkv + bqkv_ref[...]                                         # (ts, 3E) f32
    scale = 1.0 / math.sqrt(E)
    # Scale folded into q (S x E multiply, not S x S later); cast to bf16 once.
    q_ref[...] = (qkv[:, :E] * scale).astype(jnp.bfloat16)
    k_ref[...] = qkv[:, E:2 * E].astype(jnp.bfloat16)
    v_ref[...] = qkv[:, 2 * E:].astype(jnp.bfloat16)


def _qkv_project(x_flat, w_qkv, b_qkv, *, row_tile):
    R, E = x_flat.shape
    out_spec = pl.BlockSpec((row_tile, E), lambda r: (r, 0))
    return pl.pallas_call(
        _qkv_proj_kernel,
        out_shape=(jax.ShapeDtypeStruct((R, E), jnp.bfloat16),) * 3,
        grid_spec=pltpu.PrefetchScalarGridSpec(
            num_scalar_prefetch=0,
            grid=(R // row_tile,),
            in_specs=[
                pl.BlockSpec((row_tile, E), lambda r: (r, 0)),        # x rows
                pl.BlockSpec((E, 3 * E), lambda r: (0, 0)),           # fused W_qkv
                pl.BlockSpec((1, 3 * E), lambda r: (0, 0)),           # fused b_qkv
            ],
            out_specs=(out_spec, out_spec, out_spec),
        ),
        compiler_params=pltpu.CompilerParams(
            dimension_semantics=("parallel",)),
    )(x_flat, w_qkv, b_qkv)


# --------------------------------------------------------------------------- #
# Kernel 2: flash-style KV-tiled attention + fused output projection
# --------------------------------------------------------------------------- #
def _flash_kernel(q_ref, k_ref, v_ref, wo_ref, bo_ref, o_ref,
                  m_sc, l_sc, acc_sc, *, s_actual, s_pad):
    kv = pl.program_id(2)
    n_kv = pl.num_programs(2)
    tq = q_ref.shape[1]
    tk = k_ref.shape[1]

    @pl.when(kv == 0)
    def _init():
        m_sc[...] = jnp.full_like(m_sc, -jnp.inf)
        l_sc[...] = jnp.zeros_like(l_sc)
        acc_sc[...] = jnp.zeros_like(acc_sc)

    q = q_ref[0]                                                      # (tq, E) bf16, pre-scaled
    k = k_ref[0]                                                      # (tk, E) bf16
    # Contract on the last dim of both operands (no explicit transpose / XLU pass).
    s = lax.dot_general(q, k, (((1,), (1,)), ((), ())),
                        preferred_element_type=jnp.float32)           # (tq, tk) f32

    if s_pad != s_actual:                                             # static branch
        key_pos = kv * tk + lax.broadcasted_iota(jnp.int32, (tq, tk), 1)
        s = jnp.where(key_pos < s_actual, s, -jnp.inf)                # mask padded keys

    # Online softmax with DEFERRED normalisation (normalise acc once at the end).
    m_prev = m_sc[...]
    m_new = jnp.maximum(m_prev, s.max(axis=-1, keepdims=True))
    alpha = jnp.exp(m_prev - m_new)
    e = jnp.exp(s - m_new)                                            # unnormalised probs
    l_sc[...] = alpha * l_sc[...] + e.sum(axis=-1, keepdims=True)
    acc_sc[...] = alpha * acc_sc[...] + jnp.dot(
        e.astype(jnp.bfloat16), v_ref[0], preferred_element_type=jnp.float32)
    m_sc[...] = m_new

    @pl.when(kv == n_kv - 1)
    def _finalize():
        ctx = acc_sc[...] * pl.reciprocal(l_sc[...], approx=True)     # (tq, E)
        out = jnp.dot(ctx.astype(jnp.bfloat16), wo_ref[...],
                      preferred_element_type=jnp.float32) + bo_ref[...]
        o_ref[0] = out.astype(o_ref.dtype)


def _kv_block_spec(tk, E, multi_kv):
    """K/V BlockSpec; request 3-deep buffering when the KV axis actually tiles."""
    idx = lambda b, qi, ki: (b, ki, 0)
    if multi_kv and hasattr(pl, "Buffered"):
        try:
            return pl.BlockSpec((1, tk, E), idx, pipeline_mode=pl.Buffered(3))
        except TypeError:
            pass
    return pl.BlockSpec((1, tk, E), idx)


def _flash_attention(q, k, v, w_o, b_o, *, s_actual, tq, tk, out_dtype, vmem_limit):
    B, s_pad, E = q.shape
    nq, nkv = s_pad // tq, s_pad // tk
    kernel = functools.partial(_flash_kernel, s_actual=s_actual, s_pad=s_pad)
    return pl.pallas_call(
        kernel,
        out_shape=jax.ShapeDtypeStruct((B, s_pad, E), out_dtype),
        grid_spec=pltpu.PrefetchScalarGridSpec(
            num_scalar_prefetch=0,
            grid=(B, nq, nkv),                                        # kv axis last
            in_specs=[
                pl.BlockSpec((1, tq, E), lambda b, qi, ki: (b, qi, 0)),   # q tile
                _kv_block_spec(tk, E, nkv >= 2),                          # k tile
                _kv_block_spec(tk, E, nkv >= 2),                          # v tile
                pl.BlockSpec((E, E), lambda b, qi, ki: (0, 0)),           # W_o
                pl.BlockSpec((1, E), lambda b, qi, ki: (0, 0)),           # b_o
            ],
            out_specs=pl.BlockSpec((1, tq, E), lambda b, qi, ki: (b, qi, 0)),
            scratch_shapes=[
                pltpu.VMEM((tq, 1), jnp.float32),   # running max m
                pltpu.VMEM((tq, 1), jnp.float32),   # running denominator l
                pltpu.VMEM((tq, E), jnp.float32),   # unnormalised context acc
            ],
        ),
        compiler_params=pltpu.CompilerParams(
            dimension_semantics=("parallel", "parallel", "arbitrary"),
            vmem_limit_bytes=vmem_limit),
    )(q, k, v, w_o, b_o)


# --------------------------------------------------------------------------- #
# Chip-aware tiling and top-level wrapper
# --------------------------------------------------------------------------- #
def _round_up(x, m):
    return (x + m - 1) // m * m


def _chip_hints():
    """(physical VMEM bytes, is_v5) with conservative fallbacks."""
    vmem = 64 << 20                       # conservative: v7x physical VMEM / TC
    try:
        vmem = int(pltpu.get_tpu_info().vmem_capacity_bytes)
    except Exception:
        pass
    is_v5 = False
    try:
        is_v5 = "v5" in jax.devices()[0].device_kind.lower()
    except Exception:
        pass
    return vmem, is_v5


def _choose_tiles(S, tq, tk, vmem_bytes, is_v5):
    """Pick flash q/kv tile sizes; returns (tq, tk, padded S)."""
    S8 = _round_up(S, 8)
    if tq is None:
        # Single KV step when the full-S score tile is well under the VMEM budget.
        if 2 * S8 * S8 * 4 <= vmem_bytes // 8 and S8 <= 1024:
            tq = S8
        else:
            # v5e MXU is 4x128^2 (and has the smallest scoped VMEM): 128-row q tiles.
            tq = 128 if (is_v5 or vmem_bytes <= (64 << 20)) else 256
    if tk is None:
        tk = S8 if tq >= S8 else 512
    tq = min(tq, S8)
    tk = min(tk, S8)
    s_pad = _round_up(S8, math.lcm(tq, tk))
    return tq, tk, s_pad


def _choose_row_tile(R):
    for t in (1024, 512, 256, 128, 64, 32, 16, 8):
        if R % t == 0:
            return t
    return R


def attention_forward(x, w_qkv, b_qkv, w_o, b_o, *, tq=None, tk=None):
    """Single-head self-attention forward (batch_first), matching the module.

    x      : (B, S, E) float32
    w_qkv  : (E, 3E) fused [Wq | Wk | Wv] in `x @ W` layout
    b_qkv  : (1, 3E) fused [bq | bk | bv]
    w_o    : (E, E)  output projection in `x @ W` layout
    b_o    : (1, E)
    """
    B, S, E = x.shape
    vmem_bytes, is_v5 = _chip_hints()
    tq, tk, s_pad = _choose_tiles(S, tq, tk, vmem_bytes, is_v5)

    if s_pad != S:
        x = jnp.pad(x, ((0, 0), (0, s_pad - S), (0, 0)))

    # ---- kernel 1: fused QKV projection over batch-flattened rows (bf16 out) ----
    rows = B * s_pad
    q, k, v = _qkv_project(x.reshape(rows, E), w_qkv.astype(jnp.bfloat16), b_qkv,
                           row_tile=_choose_row_tile(rows))
    q = q.reshape(B, s_pad, E)
    k = k.reshape(B, s_pad, E)
    v = v.reshape(B, s_pad, E)

    # ---- kernel 2: flash attention + fused output projection ----
    vmem_limit = max(32 << 20, min(int(0.75 * vmem_bytes), 96 << 20))
    out = _flash_attention(q, k, v, w_o.astype(jnp.bfloat16), b_o,
                           s_actual=S, tq=tq, tk=tk,
                           out_dtype=x.dtype, vmem_limit=vmem_limit)
    return out[:, :S, :] if s_pad != S else out


# --------------------------------------------------------------------------- #
# Pure-JAX f32 reference (matches nn.MultiheadAttention forward, single head)
# --------------------------------------------------------------------------- #
def reference(x, wq, wk, wv, wo, bq, bk, bv, bo):
    E = x.shape[-1]
    q = x @ wq + bq
    k = x @ wk + bk
    v = x @ wv + bv
    s = jnp.einsum('bqe,bke->bqk', q, k) / math.sqrt(E)
    p = jax.nn.softmax(s, axis=-1)
    ctx = jnp.einsum('bqk,bke->bqe', p, v)
    return ctx @ wo + bo


if __name__ == "__main__":
    E = 128
    key = jax.random.PRNGKey(0)
    kx, kx2, kin, kbin, kwo, kbo = jax.random.split(key, 6)

    # Synthetic parameters in nn.MultiheadAttention layout:
    #   in_proj_weight (3E, E), in_proj_bias (3E,), out_proj.weight (E, E), out_proj.bias (E,)
    in_proj_w = jax.random.normal(kin, (3 * E, E), dtype=jnp.float32) * (1.0 / math.sqrt(E))
    in_proj_b = jax.random.normal(kbin, (3 * E,), dtype=jnp.float32) * 0.02
    out_w = jax.random.normal(kwo, (E, E), dtype=jnp.float32) * (1.0 / math.sqrt(E))
    out_b = jax.random.normal(kbo, (E,), dtype=jnp.float32) * 0.02

    # PyTorch computes x @ W^T; pre-transpose so the kernels compute x @ W.
    wq, wk, wv = in_proj_w[:E].T, in_proj_w[E:2 * E].T, in_proj_w[2 * E:].T
    wo = out_w.T
    bq = in_proj_b[:E].reshape(1, E)
    bk = in_proj_b[E:2 * E].reshape(1, E)
    bv = in_proj_b[2 * E:].reshape(1, E)
    bo = out_b.reshape(1, E)

    w_qkv = jnp.concatenate([wq, wk, wv], axis=1)          # (E, 3E)
    b_qkv = jnp.concatenate([bq, bk, bv], axis=1)          # (1, 3E)

    # --- primary test: module-sized small input (B=2, S=8, E=128), single-KV-tile path ---
    B, S = 2, 8
    x = jax.random.normal(kx, (B, S, E), dtype=jnp.float32)
    out = jax.block_until_ready(attention_forward(x, w_qkv, b_qkv, wo, bo))
    ref = reference(x, wq, wk, wv, wo, bq, bk, bv, bo)
    assert out.shape == (B, S, E)
    # bf16 MXU inputs (f32 accumulation) + approx reciprocal -> 2e-2 tolerance (intentional).
    assert jnp.allclose(out, ref, atol=2e-2, rtol=2e-2), "mismatch vs reference (small-S path)"

    # --- secondary test: exercise the flash/KV-tiled path incl. key masking (S=320 -> pad 384) ---
    B2, S2 = 2, 320
    x2 = jax.random.normal(kx2, (B2, S2, E), dtype=jnp.float32)
    out2 = jax.block_until_ready(
        attention_forward(x2, w_qkv, b_qkv, wo, bo, tq=128, tk=128))
    ref2 = reference(x2, wq, wk, wv, wo, bq, bk, bv, bo)
    assert out2.shape == (B2, S2, E)
    assert jnp.allclose(out2, ref2, atol=2e-2, rtol=2e-2), "mismatch vs reference (flash path)"

    print("KERNEL_OK")
</pallas_src>

<mosaic_0001>
module attributes {stable_mosaic.version = 11 : i64} {
  func.func @_qkv_proj_kernel(%arg0: i32, %arg1: memref<16x128xf32, #tpu.memory_space<vmem>>, %arg2: memref<128x384xbf16, #tpu.memory_space<vmem>>, %arg3: memref<1x384xf32, #tpu.memory_space<vmem>>, %arg4: memref<16x128xbf16, #tpu.memory_space<vmem>>, %arg5: memref<16x128xbf16, #tpu.memory_space<vmem>>, %arg6: memref<16x128xbf16, #tpu.memory_space<vmem>>) attributes {dimension_semantics = [#tpu.dimension_semantics<parallel>], iteration_bounds = array<i64: 1>, scalar_prefetch = 0 : i64, scratch_operands = 0 : i64, tpu.core_type = #tpu.core_type<tc>, window_params = [{transform_indices = @transform_0, window_bounds = array<i64: 16, 128>}, {pipeline_mode = #tpu.pipeline_mode<synchronous>, transform_indices = @transform_1, window_bounds = array<i64: 128, 384>}, {pipeline_mode = #tpu.pipeline_mode<synchronous>, transform_indices = @transform_2, window_bounds = array<i64: 1, 384>}, {transform_indices = @transform_3, window_bounds = array<i64: 16, 128>}, {transform_indices = @transform_4, window_bounds = array<i64: 16, 128>}, {transform_indices = @transform_5, window_bounds = array<i64: 16, 128>}]} {
    %c0 = arith.constant 0 : index
    %c0_0 = arith.constant 0 : index
    %0 = vector.load %arg1[%c0, %c0_0] : memref<16x128xf32, #tpu.memory_space<vmem>>, vector<16x128xf32>
    %1 = arith.truncf %0 : vector<16x128xf32> to vector<16x128xbf16>
    %c0_1 = arith.constant 0 : index
    %c0_2 = arith.constant 0 : index
    %2 = vector.load %arg2[%c0_1, %c0_2] : memref<128x384xbf16, #tpu.memory_space<vmem>>, vector<128x384xbf16>
    %cst = arith.constant dense<0.000000e+00> : vector<16x384xf32>
    %3 = tpu.matmul %1, %2, %cst {dimension_numbers = #tpu.dot_dimension_numbers<[1], [0], [0], [1], [0, 0, 1, 1], [], []>} : vector<16x128xbf16>, vector<128x384xbf16>, vector<16x384xf32> -> vector<16x384xf32>
    %c0_3 = arith.constant 0 : index
    %c0_4 = arith.constant 0 : index
    %4 = vector.load %arg3[%c0_3, %c0_4] : memref<1x384xf32, #tpu.memory_space<vmem>>, vector<1x384xf32>
    %5 = vector.broadcast %4 : vector<1x384xf32> to vector<16x384xf32>
    %6 = arith.addf %3, %5 : vector<16x384xf32>
    %7 = vector.extract_strided_slice %6 {offsets = [0, 0], sizes = [16, 128], strides = [1, 1]} : vector<16x384xf32> to vector<16x128xf32>
    %cst_5 = arith.constant 0.0883883461 : f32
    %8 = vector.broadcast %cst_5 : f32 to vector<16x128xf32>
    %9 = arith.mulf %7, %8 : vector<16x128xf32>
    %10 = arith.truncf %9 : vector<16x128xf32> to vector<16x128xbf16>
    %c0_6 = arith.constant 0 : index
    %c0_7 = arith.constant 0 : index
    %11 = vector.load %arg4[%c0_6, %c0_7] : memref<16x128xbf16, #tpu.memory_space<vmem>>, vector<16x128xbf16>
    tpu.vector_store %arg4[%c0_6, %c0_7], %10 {strides = array<i32>} : memref<16x128xbf16, #tpu.memory_space<vmem>>, vector<16x128xbf16>,
    %12 = vector.extract_strided_slice %6 {offsets = [0, 128], sizes = [16, 128], strides = [1, 1]} : vector<16x384xf32> to vector<16x128xf32>
    %13 = arith.truncf %12 : vector<16x128xf32> to vector<16x128xbf16>
    %c0_8 = arith.constant 0 : index
    %c0_9 = arith.constant 0 : index
    %14 = vector.load %arg5[%c0_8, %c0_9] : memref<16x128xbf16, #tpu.memory_space<vmem>>, vector<16x128xbf16>
    tpu.vector_store %arg5[%c0_8, %c0_9], %13 {strides = array<i32>} : memref<16x128xbf16, #tpu.memory_space<vmem>>, vector<16x128xbf16>,
    %15 = vector.extract_strided_slice %6 {offsets = [0, 256], sizes = [16, 128], strides = [1, 1]} : vector<16x384xf32> to vector<16x128xf32>
    %16 = arith.truncf %15 : vector<16x128xf32> to vector<16x128xbf16>
    %c0_10 = arith.constant 0 : index
    %c0_11 = arith.constant 0 : index
    %17 = vector.load %arg6[%c0_10, %c0_11] : memref<16x128xbf16, #tpu.memory_space<vmem>>, vector<16x128xbf16>
    tpu.vector_store %arg6[%c0_10, %c0_11], %16 {strides = array<i32>} : memref<16x128xbf16, #tpu.memory_space<vmem>>, vector<16x128xbf16>,
    return
  }
  func.func @transform_0(%arg0: i32) -> (i32, i32) {
    %c0_i32 = arith.constant 0 : i32
    %c0_i32_0 = arith.constant 0 : i32
    return %arg0, %c0_i32 : i32, i32
  }
  func.func @transform_1(%arg0: i32) -> (i32, i32) {
    %c0_i32 = arith.constant 0 : i32
    %c0_i32_0 = arith.constant 0 : i32
    %c0_i32_1 = arith.constant 0 : i32
    return %c0_i32, %c0_i32_0 : i32, i32
  }
  func.func @transform_2(%arg0: i32) -> (i32, i32) {
    %c0_i32 = arith.constant 0 : i32
    %c0_i32_0 = arith.constant 0 : i32
    %c0_i32_1 = arith.constant 0 : i32
    return %c0_i32, %c0_i32_0 : i32, i32
  }
  func.func @transform_3(%arg0: i32) -> (i32, i32) {
    %c0_i32 = arith.constant 0 : i32
    %c0_i32_0 = arith.constant 0 : i32
    return %arg0, %c0_i32 : i32, i32
  }
  func.func @transform_4(%arg0: i32) -> (i32, i32) {
    %c0_i32 = arith.constant 0 : i32
    %c0_i32_0 = arith.constant 0 : i32
    return %arg0, %c0_i32 : i32, i32
  }
  func.func @transform_5(%arg0: i32) -> (i32, i32) {
    %c0_i32 = arith.constant 0 : i32
    %c0_i32_0 = arith.constant 0 : i32
    return %arg0, %c0_i32 : i32, i32
  }
}

</mosaic_0001>

<bundles_post_ra>
// kernel: tpu_custom_call.1
= control target key start
LH: loop header
LB: loop body
LE: loop exit
PB: predicated region body
PF: predicated region fallthrough
CT: control target
= control target key end

     0   :  { %11 = vsyncpa [#allocation3], 0  ;;  %s767_s0 = inlined_call_operand.hbm [shape: f32[16,128], index: 0, kind: input, shape index: {}]   ;;  %s768_s1 = inlined_call_operand.hbm [shape: bf16[128,384], index: 1, kind: input, shape index: {}]   ;;  %s769_s2 = inlined_call_operand.vmem [shape: f32[1,384], index: 2, kind: input, shape index: {}]   ;;  %s770_s3 = inlined_call_operand.hbm [shape: bf16[16,128], index: 3, kind: output, shape index: {0}]   ;;  %s771_s4 = inlined_call_operand.hbm [shape: bf16[16,128], index: 4, kind: output, shape index: {1}]   ;;  %s772_s5 = inlined_call_operand.hbm [shape: bf16[16,128], index: 5, kind: output, shape index: {2}]  }
   0x1   :  { %12 = vsyncpa [#allocation6], 0 }
   0x2   :  { %13 = vsyncpa [#allocation4], 0 }
   0x3   :  { %14 = vsyncpa [#allocation9], 0  ;;  %s637_s18 = smov [#allocation2]   ;;  %s519_s22 = scalar_lea.hbm %s767_s0, 256 }
   0x4   :  { %s20_s19 = sshll.u32 %s637_s18, 4  ;;  %p520_p0 = scmp.ne.s32.totalorder %s767_s0, %s519_s22  ;;  %s21_s19 = int_to_ptr.vmem [resolvable:$true] %s20_s19 }
   0x5   :  { %p523_p1 = scmp.lt.u32.totalorder %s519_s22, %s767_s0 }
   0x7   :  { %p525_p2 = pnand %p523_p1, %p520_p0 }
   0x9   :  { %528 = shalt.err (!%p525_p2)
}
   0xa   :  { %s529_s27 = scalar_lea.vmem %s21_s19, 256  ;;  %p534_p4 = scmp.lt.s32.totalorder %s21_s19, %s21_s19 }
   0xb   :  { %p530_p3 = scmp.ne.s32.totalorder %s21_s19, %s529_s27  ;;  %p535_p5 = scmp.lt.s32.totalorder %s529_s27, %s529_s27 }
   0xd   :  { %p536_p6 = por %p535_p5, %p534_p4 }
   0xf   :  { %p537_p7 = pnand %p536_p6, %p530_p3 }
  0x11   :  { %540 = shalt.err (!%p537_p7)
}
  0x12   :  { %s638_s28 = smov 128   ;;  %s639_s29 = smov 8  }
  0x13   :  { %26 = dma.hbm_to_vmem [thread:$0]  %s767_s0, 256, %s21_s19, [#allocation3], %s638_s28, %s638_s28, %s639_s29  }
  0x14   :  { %s640_s7 = smov [#allocation5]   ;;  %s541_s11 = scalar_lea.hbm %s768_s1, 3072 }
  0x15   :  { %s32_s8 = sshll.u32 %s640_s7, 4  ;;  %p542_p8 = scmp.ne.s32.totalorder %s768_s1, %s541_s11  ;;  %s33_s8 = int_to_ptr.vmem [resolvable:$true] %s32_s8 }
  0x16   :  { %p545_p9 = scmp.lt.u32.totalorder %s541_s11, %s768_s1 }
  0x18   :  { %p547_p10 = pnand %p545_p9, %p542_p8 }
  0x1a   :  { %550 = shalt.err (!%p547_p10)
}
  0x1b   :  { %s551_s16 = scalar_lea.vmem %s33_s8, 3072  ;;  %p556_p12 = scmp.lt.s32.totalorder %s33_s8, %s33_s8 }
  0x1c   :  { %p552_p11 = scmp.ne.s32.totalorder %s33_s8, %s551_s16  ;;  %p557_p13 = scmp.lt.s32.totalorder %s551_s16, %s551_s16 }
  0x1e   :  { %p558_p0 = por %p557_p13, %p556_p12 }
  0x20   :  { %p559_p1 = pnand %p558_p0, %p552_p11 }
  0x22   :  { %562 = shalt.err (!%p559_p1)
}
  0x23   :  { %s641_s0 = smov 192   ;;  %s642_s17 = smov 12  }
  0x24   :  { %38 = dma.hbm_to_vmem [thread:$0]  %s768_s1, 3072, %s33_s8, [#allocation6], %s641_s0, %s641_s0, %s642_s17  }
  0x25   :  { %629 = dma.done.wait [#allocation3], 256  }
  0x26   :  { %630 = vsyncadd [#allocation3], 4294967040 }
  0x27   :  { %631 = dma.done.wait [#allocation6], 3072  }
  0x28   :  { %632 = vsyncadd [#allocation6], 4294964224  ;;  %v643_v0 = vmov 0.0   ;;  %vm644_vm0 = vmmov 0   ;;  %v645_v1 = vmov 0   ;;  %v48_v25 = vld [vmem:[#allocation2] sm:$0xff]  ;;  %v85_v29 = vlaneseq }
  0x29   :  { %453 = vmatprep.subr.bf16.mxu1 %v643_v0  ;;  %469 = vmatprep.mubr.msk.bf16.mxu1 %vm644_vm0, %v643_v0  ;;  %v487_v2 = vld [vmem:[#allocation5 + $0x4] ss:$12 sps:$4 sm:$0xff]   ;;  %v489_v3 = vld [vmem:[#allocation5 + $0x8] ss:$12 sps:$4 sm:$0xff]   ;;  %v490_v4 = vld [vmem:[#allocation5] ss:$12 sps:$4 sm:$0xff]  }
  0x2a   :  { %260 = vmatprep.mubr.bf16.mxu0 %v645_v1  ;;  %228 = vmatprep.subr.bf16.mxu0 %v487_v2  ;;  %v491_v5 = vld [vmem:[#allocation5 + $0x1c] ss:$12 sps:$4 sm:$0xff]   ;;  %v493_v6 = vld [vmem:[#allocation5 + $0x20] ss:$12 sps:$4 sm:$0xff]   ;;  %v494_v7 = vld [vmem:[#allocation5 + $0x18] ss:$12 sps:$4 sm:$0xff]  }
  0x2b   :  { %454 = vmatpush3.bf16.msra.mxu1 %v489_v3  ;;  %229 = vmatpush1.bf16.msra.mxu0 %v490_v4  ;;  %v495_v8 = vld [vmem:[#allocation5 + $0x34] ss:$12 sps:$4 sm:$0xff]   ;;  %v497_v9 = vld [vmem:[#allocation5 + $0x38] ss:$12 sps:$4 sm:$0xff]   ;;  %v498_v10 = vld [vmem:[#allocation5 + $0x30] ss:$12 sps:$4 sm:$0xff]  }
  0x2c   :  { %455 = vmatprep.subr.bf16.mxu1 %v643_v0  ;;  %230 = vmatprep.subr.bf16.mxu0 %v491_v5  ;;  %v499_v11 = vld [vmem:[#allocation5 + $0x4c] ss:$12 sps:$4 sm:$0xff]   ;;  %v501_v12 = vld [vmem:[#allocation5 + $0x50] ss:$12 sps:$4 sm:$0xff]   ;;  %v502_v13 = vld [vmem:[#allocation5 + $0x48] ss:$12 sps:$4 sm:$0xff]  }
  0x2d   :  { %v503_v14 = vld [vmem:[#allocation5 + $0x64] ss:$12 sps:$4 sm:$0xff]   ;;  %v505_v15 = vld [vmem:[#allocation5 + $0x68] ss:$12 sps:$4 sm:$0xff]   ;;  %v506_v16 = vld [vmem:[#allocation5 + $0x60] ss:$12 sps:$4 sm:$0xff]  }
  0x2e   :  { %v507_v17 = vld [vmem:[#allocation5 + $0x7c] ss:$12 sps:$4 sm:$0xff]   ;;  %v509_v18 = vld [vmem:[#allocation5 + $0x80] ss:$12 sps:$4 sm:$0xff]   ;;  %v510_v19 = vld [vmem:[#allocation5 + $0x78] ss:$12 sps:$4 sm:$0xff]  }
  0x2f   :  { %456 = vmatpush3.bf16.msra.mxu1 %v493_v6  ;;  %231 = vmatpush1.bf16.msra.mxu0 %v494_v7  ;;  %v511_v20 = vld [vmem:[#allocation5 + $0x94] ss:$12 sps:$4 sm:$0xff]   ;;  %v513_v21 = vld [vmem:[#allocation5 + $0x98] ss:$12 sps:$4 sm:$0xff]   ;;  %v514_v22 = vld [vmem:[#allocation5 + $0x90] ss:$12 sps:$4 sm:$0xff]  }
  0x30   :  { %457 = vmatprep.subr.bf16.mxu1 %v643_v0  ;;  %232 = vmatprep.subr.bf16.mxu0 %v495_v8  ;;  %v515_v23 = vld [vmem:[#allocation5 + $0xac] ss:$12 sps:$4 sm:$0xff]   ;;  %v517_v24 = vld [vmem:[#allocation5 + $0xb0] ss:$12 sps:$4 sm:$0xff]   ;;  %v518_v27 = vld [vmem:[#allocation5 + $0xa8] ss:$12 sps:$4 sm:$0xff]  }
  0x31   :  { %v49_v26 = vld [vmem:[#allocation2 + $0x8] sm:$0xff]  ;;  %v86_v30 = vshrl.u32 %v85_v29, 7  ;;  %v83_v33 = vld [vmem:[%s769_s2] sm:$0x7]  ;;  %s646_s21 = smov [#allocation8]   ;;  %s647_s2 = smov [#allocation7]  }
  0x32   :  { %v50_v28 = vpack.c.bf16 %v49_v26, %v48_v25  ;;  %s361_s22 = sshll.u32 %s646_s21, 4  ;;  %s349_s23 = sshll.u32 %s647_s2, 4  ;;  %s362_s22 = int_to_ptr.vmem [resolvable:$true] %s361_s22  ;;  %s708_s23 = int_to_ptr.vmem [resolvable:$true] %s349_s23 }
  0x33   :  { %458 = vmatpush3.bf16.msra.mxu1 %v497_v9  ;;  %233 = vmatpush1.bf16.msra.mxu0 %v498_v10  ;;  %v95_v31 = vsub.s32 2, %v86_v30  ;;  %v87_v32 = vsub.s32 0, %v86_v30  ;;  %v91_v35 = vsub.s32 1, %v86_v30  ;;  %s648_s24 = smov [#allocation10]   ;;  %s563_s26 = scalar_lea.vmem %s362_s22, 128 }
  0x34   :  { %459 = vmatprep.subr.bf16.mxu1 %v643_v0  ;;  %234 = vmatprep.subr.bf16.mxu0 %v499_v11  ;;  %s373_s25 = sshll.u32 %s648_s24, 4  ;;  %p564_p2 = scmp.ne.s32.totalorder %s362_s22, %s563_s26  ;;  %s710_s25 = int_to_ptr.vmem [resolvable:$true] %s373_s25 }
  0x35   :  { %v96_v34 = vrot.slane %v83_v33, %v95_v31  ;;  %v88_v36 = vrot.slane %v83_v33, %v87_v32  ;;  %v92_v41 = vrot.slane %v83_v33, %v91_v35  ;;  %p568_p3 = scmp.lt.s32.totalorder %s362_s22, %s362_s22  ;;  %p569_p4 = scmp.lt.s32.totalorder %s563_s26, %s563_s26 }
  0x37   :  { %460 = vmatpush3.bf16.msra.mxu1 %v501_v12  ;;  %235 = vmatpush1.bf16.msra.mxu0 %v502_v13  ;;  %p570_p5 = por %p569_p4, %p568_p3 }
  0x38   :  { %461 = vmatprep.subr.bf16.mxu1 %v643_v0  ;;  %236 = vmatprep.subr.bf16.mxu0 %v503_v14 }
  0x39   :  { %p571_p6 = pnand %p570_p5, %p564_p2 }
  0x3b   :  { %462 = vmatpush3.bf16.msra.mxu1 %v505_v15  ;;  %237 = vmatpush1.bf16.msra.mxu0 %v506_v16 }
  0x3c   :  { %463 = vmatprep.subr.bf16.mxu1 %v643_v0  ;;  %238 = vmatprep.subr.bf16.mxu0 %v507_v17 }
  0x3f   :  { %464 = vmatpush3.bf16.msra.mxu1 %v509_v18  ;;  %239 = vmatpush1.bf16.msra.mxu0 %v510_v19 }
  0x40   :  { %465 = vmatprep.subr.bf16.mxu1 %v643_v0  ;;  %240 = vmatprep.subr.bf16.mxu0 %v511_v20 }
  0x43   :  { %466 = vmatpush3.bf16.msra.mxu1 %v513_v21  ;;  %241 = vmatpush1.bf16.msra.mxu0 %v514_v22 }
  0x44   :  { %467 = vmatprep.subr.bf16.mxu1 %v643_v0  ;;  %242 = vmatprep.subr.bf16.mxu0 %v515_v23 }
  0x47   :  { %468 = vmatpush3.bf16.msra.mxu1 %v517_v24  ;;  %243 = vmatpush1.bf16.msra.mxu0 %v518_v27 }
  0x4a   :  { %470 = vmatmul.mubr.bf16.vlgmr.msra.gmra.mrb[0].mxu1 %v50_v28  ;;  %261 = vmatmul.mubr.bf16.vlgmr.msra.gmra.mrb[0].mxu0 %v50_v28 }
 0x11d   :  { %v305_v37 = vpop.f32.mrb[0].mxu1  ;;  %v262_v39 = vpop.f32.mrb[0].mxu0 }
 0x11e   :  { %v306_v38 = vadd.f32 %v305_v37, %v96_v34  ;;  %v471_v40 = vpop.f32.mrb[1].mxu1  ;;  %v263_v42 = vadd.f32 %v262_v39, %v88_v36  ;;  %v264_v43 = vpop.f32.mrb[1].mxu0 }
 0x11f   :  { %v308_v44 = vpop.f32.mrb[2].mxu1  ;;  %v266_v46 = vpop.f32.mrb[2].mxu0  ;;  %v265_v50 = vadd.f32 %v264_v43, %v92_v41 }
 0x120   :  { %v309_v45 = vadd.f32 %v308_v44, %v96_v34  ;;  %v472_v47 = vpop.f32.mrb[3].mxu1  ;;  %v267_v48 = vadd.f32 %v266_v46, %v88_v36  ;;  %v268_v49 = vpop.f32.mrb[3].mxu0  ;;  %v312_v53 = vmul.f32 0.088388346, %v263_v42 }
 0x121   :  { %v269_v52 = vadd.f32 %v268_v49, %v92_v41 }
 0x122   :  { %v442_v51 = vpack.c.bf16 %v309_v45, %v306_v38  ;;  %v313_v54 = vmul.f32 0.088388346, %v267_v48 }
 0x123   :  { %v437_v55 = vpack.c.bf16 %v269_v52, %v265_v50 }
 0x124   :  { %443 = vst [vmem:[#allocation10] sm:$0xff] %v442_v51   ;;  %v432_v56 = vpack.c.bf16 %v313_v54, %v312_v53 }
 0x125   :  { %438 = vst [vmem:[#allocation8] sm:$0xff] %v437_v55  }
 0x126   :  { %433 = vst [vmem:[#allocation7] sm:$0xff] %v432_v56  }
 0x127   :  { %574 = shalt.err (!%p571_p6)
}
 0x128   :  { %s575_s29 = scalar_lea.hbm %s771_s4, 128 }
 0x129   :  { %p576_p7 = scmp.ne.s32.totalorder %s771_s4, %s575_s29  ;;  %p579_p8 = scmp.lt.u32.totalorder %s575_s29, %s771_s4 }
 0x12b   :  { %p581_p9 = pnand %p579_p8, %p576_p7 }
 0x12d   :  { %584 = shalt.err (!%p581_p9)
}
 0x12e   :  { %s649_s9 = smov 64   ;;  %s650_s10 = smov 4  }
 0x12f   :  { %367 = dma.vmem_to_hbm [thread:$0]  %s362_s22, 128, %s771_s4, [#allocation9], %s649_s9, %s649_s9, %s650_s10  }
 0x130   :  { %s585_s13 = scalar_lea.vmem %s708_s23, 128  ;;  %p590_p11 = scmp.lt.s32.totalorder %s708_s23, %s708_s23 }
 0x131   :  { %p586_p10 = scmp.ne.s32.totalorder %s708_s23, %s585_s13  ;;  %p591_p12 = scmp.lt.s32.totalorder %s585_s13, %s585_s13 }
 0x133   :  { %p592_p13 = por %p591_p12, %p590_p11 }
 0x135   :  { %p593_p0 = pnand %p592_p13, %p586_p10 }
 0x137   :  { %596 = shalt.err (!%p593_p0)
}
 0x138   :  { %s597_s16 = scalar_lea.hbm %s770_s3, 128 }
 0x139   :  { %p598_p1 = scmp.ne.s32.totalorder %s770_s3, %s597_s16  ;;  %p601_p2 = scmp.lt.u32.totalorder %s597_s16, %s770_s3 }
 0x13b   :  { %p603_p3 = pnand %p601_p2, %p598_p1 }
 0x13d   :  { %606 = shalt.err (!%p603_p3)
}
 0x13e   :  { %355 = dma.vmem_to_hbm [thread:$0]  %s708_s23, 128, %s770_s3, [#allocation4], %s649_s9, %s649_s9, %s650_s10  }
 0x13f   :  { %s607_s20 = scalar_lea.vmem %s710_s25, 128  ;;  %p612_p5 = scmp.lt.s32.totalorder %s710_s25, %s710_s25 }
 0x140   :  { %p608_p4 = scmp.ne.s32.totalorder %s710_s25, %s607_s20  ;;  %p613_p6 = scmp.lt.s32.totalorder %s607_s20, %s607_s20 }
 0x142   :  { %p614_p7 = por %p613_p6, %p612_p5 }
 0x144   :  { %p615_p8 = pnand %p614_p7, %p608_p4 }
 0x146   :  { %618 = shalt.err (!%p615_p8)
}
 0x147   :  { %s619_s2 = scalar_lea.hbm %s772_s5, 128 }
 0x148   :  { %p620_p9 = scmp.ne.s32.totalorder %s772_s5, %s619_s2  ;;  %p623_p10 = scmp.lt.u32.totalorder %s619_s2, %s772_s5 }
 0x14a   :  { %p625_p11 = pnand %p623_p10, %p620_p9 }
 0x14c   :  { %628 = shalt.err (!%p625_p11)
}
 0x14d   :  { %379 = dma.vmem_to_hbm [thread:$0]  %s710_s25, 128, %s772_s5, [#allocation9], %s649_s9, %s649_s9, %s650_s10  }
 0x14e   :  { %633 = dma.done.wait [#allocation4], 128  }
 0x14f   :  { %634 = vsyncadd [#allocation4], 4294967168 }
 0x150   :  { %635 = dma.done.wait [#allocation9], 256  }
 0x151   :  { %636 = vsyncadd [#allocation9], 4294967040 }
 0x152   :  { %389 = vsyncpa [#allocation3], 1 }
 0x153   :  { %390 = vsyncpa [#allocation6], 1 }
 0x154   :  { %391 = vsyncpa [#allocation4], 1 }
 0x155   :  { %392 = vsyncpa [#allocation9], 1 }

</bundles_post_ra>
